<compile_context>
chip_gen: v5e
topology: v5e:2x2
jax: 0.10.0
libtpu: 0.0.40
codegen_flags: <defaults>
</compile_context>

<pallas_src>
import jax
import jax.numpy as jnp
import numpy as np
from jax.experimental import pallas as pl
from jax.experimental.pallas import tpu as pltpu


def _round_up(a, b):
    return ((a + b - 1) // b) * b


# Conservative budgets so tile/residency choices fit v7x's 64 MiB VMEM
# (v5e/v6e have 128 MiB, so these are safe everywhere).
_VMEM_LIMIT_BYTES = 48 * 1024 * 1024
_RESIDENT_H_BUDGET_BYTES = 24 * 1024 * 1024


# ---------------------------------------------------------------------------
# Kernel 1: fused feature transform (computed once per row tile of x):
#   h = x @ W_rel              -> compute dtype, feeds the big A @ h matmul
#   r = x @ W_root + b         -> f32, seeds the accumulator in kernel 2
# ---------------------------------------------------------------------------
def feat_transform_kernel(x_ref, w_rel_ref, w_root_ref, b_ref, h_ref, r_ref):
    xb = x_ref[...]
    h_ref[...] = jnp.dot(
        xb, w_rel_ref[...], preferred_element_type=jnp.float32
    ).astype(h_ref.dtype)
    r_ref[...] = (
        jnp.dot(xb, w_root_ref[...], preferred_element_type=jnp.float32)
        + b_ref[...]
    )


# ---------------------------------------------------------------------------
# Kernel 2: out = ReLU(A @ h + r), tiled over (dst row tile, src reduction tile).
# ---------------------------------------------------------------------------
def make_graphconv_kernel(tk, h_resident):
    def kernel(a_ref, h_ref, r_ref, o_ref, acc_ref):
        k = pl.program_id(1)

        @pl.when(k == 0)
        def _init():
            # Root term + bias (computed once in kernel 1) seeds the accumulator.
            acc_ref[...] = r_ref[...]

        if h_resident:
            # h is fully VMEM-resident; take the k-th (tk, fp) slab in-kernel.
            start = pl.multiple_of(k * tk, tk)
            h_tile = h_ref[pl.ds(start, tk), :]
        else:
            h_tile = h_ref[...]

        # Dominant matmul: long contraction over source nodes, f32 accumulation.
        acc_ref[...] += jnp.dot(
            a_ref[...], h_tile, preferred_element_type=jnp.float32
        )

        @pl.when(k == pl.num_programs(1) - 1)
        def _finalize():
            o_ref[...] = jnp.maximum(acc_ref[...], 0.0).astype(o_ref.dtype)

    return kernel


def graph_conv_layer(x, edge_index, edge_attr, w_rel, w_root, b_rel, *,
                     tm=None, tk=None, compute_dtype=jnp.bfloat16):
    """GraphConv(aggr='add') + ReLU.

    x: [N, Fin] f32; edge_index: [2, E] int32; edge_attr: [E] f32.
    w_rel, w_root: [Fin, Fout] (stored transposed, y = x @ W); b_rel: [1, Fout].
    """
    n, fin = x.shape
    fout = w_rel.shape[1]
    itemsize = jnp.dtype(compute_dtype).itemsize

    # Lane-dense output / h feature dim: pad to a multiple of 128.
    fp = _round_up(max(fout, 128), 128)

    # --- tile selection -------------------------------------------------------
    if tm is None:
        # Prefer 256-row dst tiles for bandwidth, but keep >= 2 row tiles so
        # the "parallel" row axis can be sharded across v7x's two TensorCores.
        tm = 256 if _round_up(n, 256) // 256 >= 2 else 128
    if tk is None:
        # Large reduction tiles keep the mem-bound A stream near HBM roofline;
        # clamp to the 128-aligned source extent so small graphs collapse to a
        # single reduction step (the "fast path").
        tk = min(512, _round_up(n, 128))

    npad_dst = _round_up(n, tm)   # rows of A / out / r
    npad_src = _round_up(n, tk)   # cols of A / rows of h

    # h residency: fetch h once and keep it in VMEM when it fits the budget;
    # otherwise stream (tk, fp) tiles (re-read once per dst row tile).
    h_resident = (npad_src * fp * itemsize) <= _RESIDENT_H_BUDGET_BYTES

    # --- plain-JAX glue: edge list -> dense weighted adjacency ---------------
    # TODO(synk): for large sparse graphs replace the O(N^2) densification with
    # a CSR / scalar-prefetch gather formulation (row-ptr/col-idx in SMEM
    # driving manual DMA of source-node h rows) instead of a dense [N, N] A.
    src = edge_index[0]
    dst = edge_index[1]
    adj = (jnp.zeros((npad_dst, npad_src), jnp.float32)
           .at[dst, src].add(edge_attr)
           .astype(compute_dtype))

    # x is padded once to cover both extents; kernel 2's index maps only touch
    # the first npad_src rows of h and npad_dst rows of r.
    tm1 = min(tm, 256)
    npad_x = _round_up(max(npad_dst, npad_src), tm1)
    x_p = jnp.pad(x, ((0, npad_x - n), (0, 0)))
    w_rel_p = jnp.pad(w_rel, ((0, 0), (0, fp - fout)))
    w_root_p = jnp.pad(w_root, ((0, 0), (0, fp - fout)))
    b_p = jnp.pad(b_rel, ((0, 0), (0, fp - fout)))

    # --- step 1: h = x @ W_rel, r = x @ W_root + b (once, small) -------------
    h, r = pl.pallas_call(
        feat_transform_kernel,
        out_shape=(jax.ShapeDtypeStruct((npad_x, fp), compute_dtype),
                   jax.ShapeDtypeStruct((npad_x, fp), jnp.float32)),
        grid_spec=pltpu.PrefetchScalarGridSpec(
            num_scalar_prefetch=0,
            grid=(npad_x // tm1,),
            in_specs=[
                pl.BlockSpec((tm1, fin), lambda i: (i, 0)),
                pl.BlockSpec((fin, fp), lambda i: (0, 0)),
                pl.BlockSpec((fin, fp), lambda i: (0, 0)),
                pl.BlockSpec((1, fp), lambda i: (0, 0)),
            ],
            out_specs=(pl.BlockSpec((tm1, fp), lambda i: (i, 0)),
                       pl.BlockSpec((tm1, fp), lambda i: (i, 0))),
        ),
        compiler_params=pltpu.CompilerParams(
            dimension_semantics=("parallel",),
            vmem_limit_bytes=_VMEM_LIMIT_BYTES,
        ),
    )(x_p, w_rel_p, w_root_p, b_p)

    # --- step 2: tiled aggregation + root term + ReLU -------------------------
    if h_resident:
        h_spec = pl.BlockSpec((npad_src, fp), lambda i, k: (0, 0))
    else:
        h_spec = pl.BlockSpec((tk, fp), lambda i, k: (k, 0))

    out = pl.pallas_call(
        make_graphconv_kernel(tk, h_resident),
        out_shape=jax.ShapeDtypeStruct((npad_dst, fp), jnp.float32),
        grid_spec=pltpu.PrefetchScalarGridSpec(
            num_scalar_prefetch=0,
            grid=(npad_dst // tm, npad_src // tk),      # reduction (src) axis last
            in_specs=[
                pl.BlockSpec((tm, tk), lambda i, k: (i, k)),   # A tile
                h_spec,                                        # h: resident or streamed
                pl.BlockSpec((tm, fp), lambda i, k: (i, 0)),   # r tile (resident over k)
            ],
            out_specs=pl.BlockSpec((tm, fp), lambda i, k: (i, 0)),
            scratch_shapes=[pltpu.VMEM((tm, fp), jnp.float32)],
        ),
        compiler_params=pltpu.CompilerParams(
            dimension_semantics=("parallel", "arbitrary"),
            vmem_limit_bytes=_VMEM_LIMIT_BYTES,
        ),
    )(adj, h, r)

    return out[:n, :fout]


def reference(x, edge_index, edge_attr, w_rel, w_root, b_rel):
    src, dst = edge_index[0], edge_index[1]
    msgs = edge_attr[:, None] * x[src]                       # [E, Fin]
    agg = jnp.zeros_like(x).at[dst].add(msgs)                # [N, Fin]
    out = agg @ w_rel + b_rel + x @ w_root
    return jnp.maximum(out, 0.0)


if __name__ == "__main__":
    key = jax.random.PRNGKey(0)
    N, E = 256, 512
    IN_F, OUT_F = 32, 32

    k_x, k_src, k_dst, k_w, k_wr, k_wroot, k_b = jax.random.split(key, 7)

    x = jax.random.normal(k_x, (N, IN_F), dtype=jnp.float32)
    src = jax.random.randint(k_src, (E,), 0, N, dtype=jnp.int32)
    dst = jax.random.randint(k_dst, (E,), 0, N, dtype=jnp.int32)
    edge_index = jnp.stack([src, dst], axis=0)               # [2, E]
    edge_attr = jax.random.uniform(k_w, (E,), dtype=jnp.float32)

    # Parameters, shapes per GraphConv(in, out):
    #   lin_rel:  weight [out, in], bias [out]   -> stored transposed [in, out]
    #   lin_root: weight [out, in], no bias      -> stored transposed [in, out]
    bound = 1.0 / np.sqrt(IN_F)
    w_rel = jax.random.uniform(k_wr, (IN_F, OUT_F), jnp.float32, -bound, bound)
    w_root = jax.random.uniform(k_wroot, (IN_F, OUT_F), jnp.float32, -bound, bound)
    b_rel = jax.random.uniform(k_b, (1, OUT_F), jnp.float32, -bound, bound)

    y_ref = reference(x, edge_index, edge_attr, w_rel, w_root, b_rel)

    # f32 compute path: tight check (only difference vs reference is fp
    # summation order from the (A@x)@W -> A@(x@W) reassociation).
    y_f32 = graph_conv_layer(x, edge_index, edge_attr, w_rel, w_root, b_rel,
                             compute_dtype=jnp.float32)
    y_f32 = jax.block_until_ready(y_f32)
    np.testing.assert_allclose(np.asarray(y_f32), np.asarray(y_ref),
                               rtol=1e-4, atol=1e-4)

    # Default bf16 adjacency/h path (f32 accumulation): loose sanity check —
    # the only extra error is bf16 quantization of A and h.
    y_bf16 = graph_conv_layer(x, edge_index, edge_attr, w_rel, w_root, b_rel,
                              compute_dtype=jnp.bfloat16)
    y_bf16 = jax.block_until_ready(y_bf16)
    np.testing.assert_allclose(np.asarray(y_bf16), np.asarray(y_ref),
                               rtol=1e-1, atol=1e-1)

    # Also exercise the explicitly-tiled (multi-step reduction, streamed-h
    # style tile sizes) path once to make sure the k-loop accumulator works.
    y_tiled = graph_conv_layer(x, edge_index, edge_attr, w_rel, w_root, b_rel,
                               tm=128, tk=128, compute_dtype=jnp.float32)
    y_tiled = jax.block_until_ready(y_tiled)
    np.testing.assert_allclose(np.asarray(y_tiled), np.asarray(y_ref),
                               rtol=1e-4, atol=1e-4)

    print("KERNEL_OK")
</pallas_src>

<mosaic_0001>
module attributes {stable_mosaic.version = 11 : i64} {
  func.func @feat_transform_kernel(%arg0: i32, %arg1: memref<128x32xf32, #tpu.memory_space<vmem>>, %arg2: memref<32x128xf32, #tpu.memory_space<vmem>>, %arg3: memref<32x128xf32, #tpu.memory_space<vmem>>, %arg4: memref<1x128xf32, #tpu.memory_space<vmem>>, %arg5: memref<128x128xf32, #tpu.memory_space<vmem>>, %arg6: memref<128x128xf32, #tpu.memory_space<vmem>>) attributes {dimension_semantics = [#tpu.dimension_semantics<parallel>], iteration_bounds = array<i64: 2>, scalar_prefetch = 0 : i64, scratch_operands = 0 : i64, tpu.core_type = #tpu.core_type<tc>, window_params = [{transform_indices = @transform_0, window_bounds = array<i64: 128, 32>}, {pipeline_mode = #tpu.pipeline_mode<synchronous>, transform_indices = @transform_1, window_bounds = array<i64: 32, 128>}, {pipeline_mode = #tpu.pipeline_mode<synchronous>, transform_indices = @transform_2, window_bounds = array<i64: 32, 128>}, {pipeline_mode = #tpu.pipeline_mode<synchronous>, transform_indices = @transform_3, window_bounds = array<i64: 1, 128>}, {transform_indices = @transform_4, window_bounds = array<i64: 128, 128>}, {transform_indices = @transform_5, window_bounds = array<i64: 128, 128>}]} {
    %c0 = arith.constant 0 : index
    %c0_0 = arith.constant 0 : index
    %0 = vector.load %arg1[%c0, %c0_0] : memref<128x32xf32, #tpu.memory_space<vmem>>, vector<128x32xf32>
    %c0_1 = arith.constant 0 : index
    %c0_2 = arith.constant 0 : index
    %1 = vector.load %arg2[%c0_1, %c0_2] : memref<32x128xf32, #tpu.memory_space<vmem>>, vector<32x128xf32>
    %cst = arith.constant dense<0.000000e+00> : vector<128x128xf32>
    %2 = tpu.matmul %0, %1, %cst {dimension_numbers = #tpu.dot_dimension_numbers<[1], [0], [0], [1], [0, 0, 1, 1], [], []>} : vector<128x32xf32>, vector<32x128xf32>, vector<128x128xf32> -> vector<128x128xf32>
    %c0_3 = arith.constant 0 : index
    %c0_4 = arith.constant 0 : index
    %3 = vector.load %arg5[%c0_3, %c0_4] : memref<128x128xf32, #tpu.memory_space<vmem>>, vector<128x128xf32>
    tpu.vector_store %arg5[%c0_3, %c0_4], %2 {strides = array<i32>} : memref<128x128xf32, #tpu.memory_space<vmem>>, vector<128x128xf32>,
    %c0_5 = arith.constant 0 : index
    %c0_6 = arith.constant 0 : index
    %4 = vector.load %arg3[%c0_5, %c0_6] : memref<32x128xf32, #tpu.memory_space<vmem>>, vector<32x128xf32>
    %cst_7 = arith.constant dense<0.000000e+00> : vector<128x128xf32>
    %5 = tpu.matmul %0, %4, %cst_7 {dimension_numbers = #tpu.dot_dimension_numbers<[1], [0], [0], [1], [0, 0, 1, 1], [], []>} : vector<128x32xf32>, vector<32x128xf32>, vector<128x128xf32> -> vector<128x128xf32>
    %c0_8 = arith.constant 0 : index
    %c0_9 = arith.constant 0 : index
    %6 = vector.load %arg4[%c0_8, %c0_9] : memref<1x128xf32, #tpu.memory_space<vmem>>, vector<1x128xf32>
    %7 = vector.broadcast %6 : vector<1x128xf32> to vector<128x128xf32>
    %8 = arith.addf %5, %7 : vector<128x128xf32>
    %c0_10 = arith.constant 0 : index
    %c0_11 = arith.constant 0 : index
    %9 = vector.load %arg6[%c0_10, %c0_11] : memref<128x128xf32, #tpu.memory_space<vmem>>, vector<128x128xf32>
    tpu.vector_store %arg6[%c0_10, %c0_11], %8 {strides = array<i32>} : memref<128x128xf32, #tpu.memory_space<vmem>>, vector<128x128xf32>,
    return
  }
  func.func @transform_0(%arg0: i32) -> (i32, i32) {
    %c0_i32 = arith.constant 0 : i32
    %c0_i32_0 = arith.constant 0 : i32
    return %arg0, %c0_i32 : i32, i32
  }
  func.func @transform_1(%arg0: i32) -> (i32, i32) {
    %c0_i32 = arith.constant 0 : i32
    %c0_i32_0 = arith.constant 0 : i32
    %c0_i32_1 = arith.constant 0 : i32
    return %c0_i32, %c0_i32_0 : i32, i32
  }
  func.func @transform_2(%arg0: i32) -> (i32, i32) {
    %c0_i32 = arith.constant 0 : i32
    %c0_i32_0 = arith.constant 0 : i32
    %c0_i32_1 = arith.constant 0 : i32
    return %c0_i32, %c0_i32_0 : i32, i32
  }
  func.func @transform_3(%arg0: i32) -> (i32, i32) {
    %c0_i32 = arith.constant 0 : i32
    %c0_i32_0 = arith.constant 0 : i32
    %c0_i32_1 = arith.constant 0 : i32
    return %c0_i32, %c0_i32_0 : i32, i32
  }
  func.func @transform_4(%arg0: i32) -> (i32, i32) {
    %c0_i32 = arith.constant 0 : i32
    %c0_i32_0 = arith.constant 0 : i32
    return %arg0, %c0_i32 : i32, i32
  }
  func.func @transform_5(%arg0: i32) -> (i32, i32) {
    %c0_i32 = arith.constant 0 : i32
    %c0_i32_0 = arith.constant 0 : i32
    return %arg0, %c0_i32 : i32, i32
  }
}

</mosaic_0001>

<bundles_post_ra>
// kernel: tpu_custom_call.1
= control target key start
LH: loop header
LB: loop body
LE: loop exit
PB: predicated region body
PF: predicated region fallthrough
CT: control target
= control target key end

     0   :  { %11 = vsyncpa [#allocation3], 0  ;;  %s1092_s0 = inlined_call_operand.vmem [shape: f32[256,32], index: 0, kind: input, shape index: {}]   ;;  %s1093_s1 = inlined_call_operand.vmem [shape: f32[32,128], index: 1, kind: input, shape index: {}]   ;;  %s1094_s2 = inlined_call_operand.vmem [shape: f32[32,128], index: 2, kind: input, shape index: {}]   ;;  %s1095_s3 = inlined_call_operand.vmem [shape: f32[1,128], index: 3, kind: input, shape index: {}]   ;;  %s1096_s4 = inlined_call_operand.hbm [shape: f32[256,128], index: 4, kind: output, shape index: {0}]   ;;  %s1097_s5 = inlined_call_operand.hbm [shape: f32[256,128], index: 5, kind: output, shape index: {1}]  }
   0x1   :  { %13 = vsyncpa [#allocation3 + $0x1], 0 }
   0x2   :  { %14 = vsyncpa [#allocation5], 0 }
   0x3   :  { %16 = vsyncpa [#allocation5 + $0x1], 0  ;;  %s843_s18 = smov 0   ;;  %s845_s19 = smov 0  }
   0x4   :  { %s847_s20 = smov 0   ;;  %s849_s21 = smov 0  }
   0x5 LB: > { %s864_s22 = sadd.s32 4294967295, %s809_s21   ;;  %s610_s23 = sadd.s32 4294967294, %s809_s21   ;;  %s809_s21 = sphi %s849_s21, %s1103_s21   ;;  %s805_s20 = sphi %s847_s20, %s1102_s20   ;;  %s801_s19 = sphi %s845_s19, %s1101_s19   ;;  %s797_s18 = sphi %s843_s18, %s1100_s18  }
   0x6   : > { %s868_s24 = sadd.s32 1, %s809_s21   ;;  %s118_s25 = sadd.s32 1, %s805_s20 }
   0x7   : > { %s115_s26 = ssub.s32 %s809_s21, %s868_s24  ;;  %p128_p0 = scmp.ne.s32.totalorder %s805_s20, %s801_s19 }
   0x8   : > { %p116_p1 = scmp.eq.s32.totalorder %s115_s26, 0  ;;  %p129_p2 = scmp.eq.s32.totalorder %s864_s22, 1 }
   0x9   : > { %p134_p3 = scmp.ne.s32.totalorder %s801_s19, %s797_s18  ;;  %p135_p4 = scmp.eq.s32.totalorder %s610_s23, 1 }
   0xa   : > { %s879_s27 = scalar_select %p116_p1, %s805_s20, %s118_s25  }
   0xb   : > { %p881_p5 = por %p129_p2, %p128_p0  ;;  %p885_p6 = por %p135_p4, %p134_p3 }
   0xc   : > { %p613_p7 = scmp.ge.s32.totalorder %s809_s21, 1  ;;  %p197_p8 = scmp.lt.s32.totalorder %s809_s21, 3 }
   0xe   : > { %p198_p9 = pnand %p613_p7, %p197_p8 }
   0xf   : > { %s616_s11 = sshll.u32 (!%p198_p9), %s864_s22, 4  ;;  %s970_s10 = sand.u32 (!%p198_p9), 1, %s801_s19  }
  0x10   : > { %201 = sbr.rel (%p198_p9) target bundleno = 234 (0xea), region = 36  ;;  %p231_p10 = scmp.lt.s32.totalorder (!%p198_p9), %s616_s11, 31 }
  0x11   : > { %s658_s16 = sshll.u32 (!%p198_p9), %s864_s22, 7  ;;  %s735_s23 = scalar_lea.hbm (!%p198_p9), %s1096_s4, 256 }
  0x12   : > { %s494_s25 = scalar_lea.hbm (!%p198_p9), %s1096_s4, %s658_s16  ;;  %s511_s7 = scalar_lea.hbm (!%p198_p9), %s1097_s5, %s658_s16 }
  0x13   : > { %s497_s30 = sshll.u32 (!%p198_p9), %s494_s25, 4  ;;  %s1036_s30 = int_to_ptr.hbm [resolvable:$true] %s497_s30 }
  0x14   : > { %s729_s12 = sshra.s32 (!%p198_p9), %s1036_s30, 4  ;;  %s730_s12 = int_to_ptr.hbm [resolvable:$true] %s729_s12 }
  0x15   : > { %v391_v0 = vld [vmem:[%s1094_s2 + $0x18] sm:$0xff]  ;;  %v390_v2 = vld [vmem:[%s1094_s2 + $0x10] sm:$0xff]  ;;  %v389_v4 = vld [vmem:[%s1094_s2 + $0x8] sm:$0xff]  ;;  %s1105_s11 = smov (!%p231_p10, %s616_s11), 31  ;;  %vm258_vm0 = vcmask 261120   ;;  %s731_s13 = scalar_lea.hbm %s730_s12, 128 }
  0x16   : > { %v257_v1 = vld [vmem:[%s1093_s1 + $0x18] sm:$0xff]  ;;  %664 = vmatpush.msra.mxu3 %v391_v0  ;;  %v256_v3 = vld [vmem:[%s1093_s1 + $0x10] sm:$0xff]  ;;  %v255_v5 = vld [vmem:[%s1093_s1 + $0x8] sm:$0xff]  ;;  %408 = vmatpush.msra.mxu1 %v391_v0  ;;  %s617_s6 = sshll.u32 %s1105_s11, 3  ;;  %s614_s11 = sshll.u32 %s970_s10, 7 }
  0x17   : > { %660 = vmatpush.msra.mxu2 %v257_v1  ;;  %319 = vmatpush.msra.mxu0 %v257_v1  ;;  %v388_v6 = vld [vmem:[%s1094_s2] sm:$0xff]  ;;  %s919_s9 = scalar_lea.vmem %s1092_s0, %s617_s6  ;;  %s979_s14 = scalar_lea.vmem [#allocation2], %s614_s11 }
  0x18   : > { %665 = vmatpush.msra.mxu3 %v390_v2  ;;  %v254_v7 = vld [vmem:[%s1093_s1] sm:$0xff]  ;;  %409 = vmatpush.msra.mxu1 %v390_v2  ;;  %v247_v10 = vld [vmem:[%s919_s9 + $0x48] sm:$0xff]  ;;  %v248_v12 = vld [vmem:[%s919_s9 + $0x50] sm:$0xff]  ;;  %s982_s15 = scalar_lea.vmem [#allocation4], %s614_s11  ;;  %s495_s26 = sshll.u32 %s979_s14, 4  ;;  %s1034_s26 = int_to_ptr.vmem [resolvable:$true] %s495_s26 }
  0x19   : > { %661 = vmatpush.msra.mxu2 %v256_v3  ;;  %320 = vmatpush.msra.mxu0 %v256_v3  ;;  %v246_v8 = vld [vmem:[%s919_s9 + $0x40] sm:$0xff]  ;;  %v239_v11 = vld [vmem:[%s919_s9 + $0x8] sm:$0xff]  ;;  %v240_v13 = vld [vmem:[%s919_s9 + $0x10] sm:$0xff]  ;;  %s512_s8 = sshll.u32 %s982_s15, 4  ;;  %s478_s11 = scalar_lea.sflag [#allocation3], %s970_s10  ;;  %s1042_s8 = int_to_ptr.vmem [resolvable:$true] %s512_s8 }
  0x1a   : > { %666 = vmatpush.msra.mxu3 %v389_v4  ;;  %410 = vmatpush.msra.mxu1 %v389_v4  ;;  %v238_v9 = vld [vmem:[%s919_s9] sm:$0xff]  ;;  %v249_v14 = vld [vmem:[%s919_s9 + $0x58] sm:$0xff]  ;;  %v251_v18 = vld [vmem:[%s919_s9 + $0x68] sm:$0xff]  ;;  %p732_p11 = scmp.ne.s32.totalorder %s730_s12, %s731_s13  ;;  %p736_p0 = scmp.lt.s32.totalorder %s730_s12, %s1096_s4 }
  0x1b   : > { %662 = vmatpush.msra.mxu2 %v255_v5  ;;  %321 = vmatpush.msra.mxu0 %v255_v5  ;;  %v241_v15 = vld [vmem:[%s919_s9 + $0x18] sm:$0xff]  ;;  %v250_v16 = vld [vmem:[%s919_s9 + $0x60] sm:$0xff]  ;;  %v243_v19 = vld [vmem:[%s919_s9 + $0x28] sm:$0xff]  ;;  %p737_p1 = scmp.lt.s32.totalorder %s735_s23, %s731_s13 }
  0x1c   : > { %667 = vmatpush.msra.mxu3 %v388_v6  ;;  %411 = vmatpush.msra.mxu1 %v388_v6  ;;  %v242_v17 = vld [vmem:[%s919_s9 + $0x20] sm:$0xff]  ;;  %v252_v20 = vld [vmem:[%s919_s9 + $0x70] sm:$0xff]  ;;  %v253_v22 = vld [vmem:[%s919_s9 + $0x78] sm:$0xff]  ;;  %p733_p12 = pnand %p732_p11, %p881_p5 }
  0x1d   : > { %663 = vmatpush.msra.mxu2 %v254_v7  ;;  %642 = vmatmul.msk.f32.vlgmr.msra.gmra.mxu3 %vm258_vm0, %v246_v8  ;;  %v244_v21 = vld [vmem:[%s919_s9 + $0x30] sm:$0xff]  ;;  %v245_v23 = vld [vmem:[%s919_s9 + $0x38] sm:$0xff]  ;;  %v976_v24 = vld [vmem:[%s1095_s3] ss:$0 sm:$0xff]  ;;  %s514_s9 = sshll.u32 %s511_s7, 4  ;;  %p738_p2 = por %p737_p1, %p736_p0  ;;  %s1044_s9 = int_to_ptr.hbm [resolvable:$true] %s514_s9 }
  0x1e   : > { %626 = vmatmul.msk.f32.vlgmr.msra.gmra.mxu2 %vm258_vm0, %v246_v8  ;;  %322 = vmatpush.msra.mxu0 %v254_v7  ;;  %p734_p13 = pneg %p733_p12 }
  0x1f   : > { %634 = vmatmul.msk.f32.vlgmr.msra.gmra.mxu1 %vm258_vm0, %v238_v9  ;;  %618 = vmatmul.msk.f32.vlgmr.msra.gmra.mxu0 %vm258_vm0, %v238_v9 }
  0x20   : > { %p739_p3 = pnand %p738_p2, %p734_p13 }
  0x25   : > { %643 = vmatmul.msk.f32.gmra.mxu3 %vm258_vm0, %v247_v10 }
  0x26   : > { %627 = vmatmul.msk.f32.gmra.mxu2 %vm258_vm0, %v247_v10 }
  0x27   : > { %635 = vmatmul.msk.f32.gmra.mxu1 %vm258_vm0, %v239_v11  ;;  %619 = vmatmul.msk.f32.gmra.mxu0 %vm258_vm0, %v239_v11 }
  0x2d   : > { %644 = vmatmul.msk.f32.gmra.mxu3 %vm258_vm0, %v248_v12 }
  0x2e   : > { %628 = vmatmul.msk.f32.gmra.mxu2 %vm258_vm0, %v248_v12 }
  0x2f   : > { %636 = vmatmul.msk.f32.gmra.mxu1 %vm258_vm0, %v240_v13  ;;  %620 = vmatmul.msk.f32.gmra.mxu0 %vm258_vm0, %v240_v13 }
  0x35   : > { %645 = vmatmul.msk.f32.gmra.mxu3 %vm258_vm0, %v249_v14 }
  0x36   : > { %629 = vmatmul.msk.f32.gmra.mxu2 %vm258_vm0, %v249_v14 }
  0x37   : > { %637 = vmatmul.msk.f32.gmra.mxu1 %vm258_vm0, %v241_v15  ;;  %621 = vmatmul.msk.f32.gmra.mxu0 %vm258_vm0, %v241_v15 }
  0x3d   : > { %646 = vmatmul.msk.f32.gmra.mxu3 %vm258_vm0, %v250_v16 }
  0x3e   : > { %630 = vmatmul.msk.f32.gmra.mxu2 %vm258_vm0, %v250_v16 }
  0x3f   : > { %638 = vmatmul.msk.f32.gmra.mxu1 %vm258_vm0, %v242_v17  ;;  %622 = vmatmul.msk.f32.gmra.mxu0 %vm258_vm0, %v242_v17 }
  0x45   : > { %647 = vmatmul.msk.f32.gmra.mxu3 %vm258_vm0, %v251_v18 }
  0x46   : > { %631 = vmatmul.msk.f32.gmra.mxu2 %vm258_vm0, %v251_v18 }
  0x47   : > { %639 = vmatmul.msk.f32.gmra.mxu1 %vm258_vm0, %v243_v19  ;;  %623 = vmatmul.msk.f32.gmra.mxu0 %vm258_vm0, %v243_v19 }
  0x4d   : > { %648 = vmatmul.msk.f32.gmra.mxu3 %vm258_vm0, %v252_v20 }
  0x4e   : > { %632 = vmatmul.msk.f32.gmra.mxu2 %vm258_vm0, %v252_v20 }
  0x4f   : > { %640 = vmatmul.msk.f32.gmra.mxu1 %vm258_vm0, %v244_v21  ;;  %624 = vmatmul.msk.f32.gmra.mxu0 %vm258_vm0, %v244_v21 }
  0x55   : > { %649 = vmatmul.msk.f32.gmra.mxu3 %vm258_vm0, %v253_v22 }
  0x56   : > { %633 = vmatmul.msk.f32.gmra.mxu2 %vm258_vm0, %v253_v22 }
  0x57   : > { %641 = vmatmul.msk.f32.gmra.mxu1 %vm258_vm0, %v245_v23  ;;  %625 = vmatmul.msk.f32.gmra.mxu0 %vm258_vm0, %v245_v23 }
  0x9c   : > { %v413_v25 = vpop.f32.mrf.mxu1  ;;  %v324_v26 = vpop.f32.mrf.mxu0 }
  0x9d   : > { %v414_v27 = vadd.f32 %v976_v24, %v413_v25  ;;  %372 = vst [vmem:[%s979_s14] sm:$0xff] %v324_v26 }
  0x9f   : > { %461 = vst [vmem:[%s982_s15] sm:$0xff] %v414_v27 }
  0xa0   : > { %v437_v28 = vpop.f32.mrf.mxu3 }
  0xa1   : > { %v348_v29 = vpop.f32.mrf.mxu2  ;;  %v438_v30 = vadd.f32 %v976_v24, %v437_v28 }
  0xa2   : > { %380 = vst [vmem:[%s979_s14 + $0x40] sm:$0xff] %v348_v29 }
  0xa3   : > { %469 = vst [vmem:[%s982_s15 + $0x40] sm:$0xff] %v438_v30 }
  0xa4   : > { %v416_v31 = vpop.f32.mrf.mxu1  ;;  %v327_v32 = vpop.f32.mrf.mxu0 }
  0xa5   : > { %v417_v33 = vadd.f32 %v976_v24, %v416_v31  ;;  %373 = vst [vmem:[%s979_s14 + $0x8] sm:$0xff] %v327_v32 }
  0xa7   : > { %462 = vst [vmem:[%s982_s15 + $0x8] sm:$0xff] %v417_v33 }
  0xa8   : > { %v440_v34 = vpop.f32.mrf.mxu3 }
  0xa9   : > { %v351_v35 = vpop.f32.mrf.mxu2  ;;  %v441_v36 = vadd.f32 %v976_v24, %v440_v34 }
  0xaa   : > { %381 = vst [vmem:[%s979_s14 + $0x48] sm:$0xff] %v351_v35 }
  0xab   : > { %470 = vst [vmem:[%s982_s15 + $0x48] sm:$0xff] %v441_v36 }
  0xac   : > { %v419_v37 = vpop.f32.mrf.mxu1  ;;  %v330_v38 = vpop.f32.mrf.mxu0 }
  0xad   : > { %v420_v39 = vadd.f32 %v976_v24, %v419_v37  ;;  %374 = vst [vmem:[%s979_s14 + $0x10] sm:$0xff] %v330_v38 }
  0xaf   : > { %463 = vst [vmem:[%s982_s15 + $0x10] sm:$0xff] %v420_v39 }
  0xb0   : > { %v443_v40 = vpop.f32.mrf.mxu3 }
  0xb1   : > { %v354_v41 = vpop.f32.mrf.mxu2  ;;  %v444_v42 = vadd.f32 %v976_v24, %v443_v40 }
  0xb2   : > { %382 = vst [vmem:[%s979_s14 + $0x50] sm:$0xff] %v354_v41 }
  0xb3   : > { %471 = vst [vmem:[%s982_s15 + $0x50] sm:$0xff] %v444_v42 }
  0xb4   : > { %v422_v43 = vpop.f32.mrf.mxu1  ;;  %v333_v44 = vpop.f32.mrf.mxu0 }
  0xb5   : > { %v423_v45 = vadd.f32 %v976_v24, %v422_v43  ;;  %375 = vst [vmem:[%s979_s14 + $0x18] sm:$0xff] %v333_v44 }
  0xb7   : > { %464 = vst [vmem:[%s982_s15 + $0x18] sm:$0xff] %v423_v45 }
  0xb8   : > { %v446_v46 = vpop.f32.mrf.mxu3 }
  0xb9   : > { %v357_v47 = vpop.f32.mrf.mxu2  ;;  %v447_v48 = vadd.f32 %v976_v24, %v446_v46 }
  0xba   : > { %383 = vst [vmem:[%s979_s14 + $0x58] sm:$0xff] %v357_v47 }
  0xbb   : > { %472 = vst [vmem:[%s982_s15 + $0x58] sm:$0xff] %v447_v48 }
  0xbc   : > { %v425_v49 = vpop.f32.mrf.mxu1  ;;  %v336_v50 = vpop.f32.mrf.mxu0 }
  0xbd   : > { %v426_v51 = vadd.f32 %v976_v24, %v425_v49  ;;  %376 = vst [vmem:[%s979_s14 + $0x20] sm:$0xff] %v336_v50 }
  0xbf   : > { %465 = vst [vmem:[%s982_s15 + $0x20] sm:$0xff] %v426_v51 }
  0xc0   : > { %v449_v52 = vpop.f32.mrf.mxu3 }
  0xc1   : > { %v360_v53 = vpop.f32.mrf.mxu2  ;;  %v450_v54 = vadd.f32 %v976_v24, %v449_v52 }
  0xc2   : > { %384 = vst [vmem:[%s979_s14 + $0x60] sm:$0xff] %v360_v53 }
  0xc3   : > { %473 = vst [vmem:[%s982_s15 + $0x60] sm:$0xff] %v450_v54 }
  0xc4   : > { %v428_v55 = vpop.f32.mrf.mxu1  ;;  %v339_v56 = vpop.f32.mrf.mxu0 }
  0xc5   : > { %v429_v57 = vadd.f32 %v976_v24, %v428_v55  ;;  %377 = vst [vmem:[%s979_s14 + $0x28] sm:$0xff] %v339_v56 }
  0xc7   : > { %466 = vst [vmem:[%s982_s15 + $0x28] sm:$0xff] %v429_v57 }
  0xc8   : > { %v452_v58 = vpop.f32.mrf.mxu3 }
  0xc9   : > { %v363_v59 = vpop.f32.mrf.mxu2  ;;  %v453_v60 = vadd.f32 %v976_v24, %v452_v58 }
  0xca   : > { %385 = vst [vmem:[%s979_s14 + $0x68] sm:$0xff] %v363_v59 }
  0xcb   : > { %474 = vst [vmem:[%s982_s15 + $0x68] sm:$0xff] %v453_v60 }
  0xcc   : > { %v431_v61 = vpop.f32.mrf.mxu1  ;;  %v342_v62 = vpop.f32.mrf.mxu0 }
  0xcd   : > { %v432_v63 = vadd.f32 %v976_v24, %v431_v61  ;;  %378 = vst [vmem:[%s979_s14 + $0x30] sm:$0xff] %v342_v62 }
  0xcf   : > { %467 = vst [vmem:[%s982_s15 + $0x30] sm:$0xff] %v432_v63 }
  0xd0   : > { %v455_v0 = vpop.f32.mrf.mxu3 }
  0xd1   : > { %v366_v1 = vpop.f32.mrf.mxu2  ;;  %v456_v2 = vadd.f32 %v976_v24, %v455_v0 }
  0xd2   : > { %386 = vst [vmem:[%s979_s14 + $0x70] sm:$0xff] %v366_v1 }
  0xd3   : > { %475 = vst [vmem:[%s982_s15 + $0x70] sm:$0xff] %v456_v2 }
  0xd4   : > { %v434_v3 = vpop.f32.mrf.mxu1  ;;  %v345_v4 = vpop.f32.mrf.mxu0 }
  0xd5   : > { %v435_v5 = vadd.f32 %v976_v24, %v434_v3  ;;  %379 = vst [vmem:[%s979_s14 + $0x38] sm:$0xff] %v345_v4 }
  0xd7   : > { %468 = vst [vmem:[%s982_s15 + $0x38] sm:$0xff] %v435_v5 }
  0xd8   : > { %v458_v6 = vpop.f32.mrf.mxu3 }
  0xd9   : > { %v369_v7 = vpop.f32.mrf.mxu2  ;;  %v459_v8 = vadd.f32 %v976_v24, %v458_v6 }
  0xda   : > { %387 = vst [vmem:[%s979_s14 + $0x78] sm:$0xff] %v369_v7 }
  0xdb   : > { %742 = shalt.err (!%p739_p3)
}
  0xdc   : > { %s811_s14 = smov 128   ;;  %s812_s6 = smov 8   ;;  %476 = vst [vmem:[%s982_s15 + $0x78] sm:$0xff] %v459_v8 }
  0xdd   : > { %668 = dma.vmem_to_hbm [thread:$0]  (%p881_p5), %s1034_s26, 2048, %s1036_s30, %s478_s11, %s811_s14, %s811_s14, %s812_s6  }
  0xde   : > { %s483_s7 = scalar_lea.sflag [#allocation5], %s970_s10  ;;  %s757_s16 = sshra.s32 %s1044_s9, 4  ;;  %s758_s16 = int_to_ptr.hbm [resolvable:$true] %s757_s16 }
  0xdf   : > { %s759_s12 = scalar_lea.hbm %s758_s16, 128  ;;  %s763_s23 = scalar_lea.hbm %s1097_s5, 256 }
  0xe0   : > { %p760_p4 = scmp.ne.s32.totalorder %s758_s16, %s759_s12  ;;  %p764_p9 = scmp.lt.s32.totalorder %s758_s16, %s1097_s5 }
  0xe1   : > { %p765_p10 = scmp.lt.s32.totalorder %s763_s23, %s759_s12 }
  0xe2   : > { %p761_p7 = pnand %p760_p4, %p881_p5 }
  0xe3   : > { %p766_p11 = por %p765_p10, %p764_p9 }
  0xe4   : > { %p762_p8 = pneg %p761_p7 }
  0xe6   : > { %p767_p12 = pnand %p766_p11, %p762_p8 }
  0xe8   : > { %770 = shalt.err (!%p767_p12)
}
  0xe9   : > { %669 = dma.vmem_to_hbm [thread:$0]  (%p881_p5), %s1042_s8, 2048, %s1044_s9, %s483_s7, %s811_s14, %s811_s14, %s812_s6  }
  0xea PF: > { %p679_p13 = scmp.ge.s32.totalorder %s809_s21, 2  ;;  %s529_s10 = sand.u32 1, %s797_s18  }
  0xeb   : > { %s530_s15 = scalar_lea.sflag [#allocation3], %s529_s10 }
  0xec   : > { %p673_p0 = pnand %p679_p13, %p885_p6 }
  0xee   : > { %p674_p1 = pneg %p673_p0 }
  0xf0   : > { %788 = dma.done.wait (%p674_p1), %s530_s15, 2048  }
  0xf1   : > { %790 = vsyncadd (%p674_p1), %s530_s15, 4294965248  ;;  %s540_s26 = scalar_lea.sflag [#allocation5], %s529_s10 }
  0xf2   : > { %792 = dma.done.wait (%p674_p1), %s540_s26, 2048  }
  0xf3   : > { %794 = vsyncadd (%p674_p1), %s540_s26, 4294965248  ;;  %p19_p5 = scmp.ge.s32.totalorder %s868_s24, 4   ;;  %s1100_s18 = smov %s801_s19 }
  0xf4   : > { %s1101_s19 = smov %s805_s20  ;;  %s1102_s20 = smov %s879_s27 }
  0xf5   : > { %s1103_s21 = smov %s868_s24  ;;  %21 = sbr.rel (!%p19_p5) target bundleno = 5 (0x5), region = 88 }
  0xfa   :  { %546 = vsyncpa [#allocation3], 1 }
  0xfb   :  { %548 = vsyncpa [#allocation3 + $0x1], 1 }
  0xfc   :  { %549 = vsyncpa [#allocation5], 1 }
  0xfd   :  { %551 = vsyncpa [#allocation5 + $0x1], 1 }

</bundles_post_ra>
